<compile_context>
chip_gen: v5e
topology: v5e:2x2
jax: 0.10.0
libtpu: 0.0.40
codegen_flags: <defaults>
</compile_context>

<pallas_src>
import functools

import jax
import jax.numpy as jnp
from jax import lax
from jax.experimental import pallas as pl
from jax.experimental.pallas import tpu as pltpu

_VMEM = pl.BlockSpec(memory_space=pltpu.MemorySpace.VMEM)
_SMEM = pl.BlockSpec(memory_space=pltpu.MemorySpace.SMEM)

NUM_CLASSES = 5  # nn.Linear(5, 5) head -> hidden_size is forced to 5


# ----------------------------------------------------------------------------
# Kernel bodies
# ----------------------------------------------------------------------------
def _tree_sum(parts):
    """Balanced add tree (shorter dependence chain than sequential accumulate)."""
    while len(parts) > 1:
        nxt = [parts[i] + parts[i + 1] for i in range(0, len(parts) - 1, 2)]
        if len(parts) % 2:
            nxt.append(parts[-1])
        parts = nxt
    return parts[0]


def _rnn_logits(tokcol_ref, embp_ref, w_hh_ref, w_lin_ref, b_lin_ref, *,
                batch, seq):
    """Fused one-hot embedding gather + unrolled Elman recurrence + linear head.

    tokcol_ref : (S*B, 1) int32, VMEM  token ids, time-major (row = t*B + b)
    embp_ref   : (V, H)   f32,  VMEM   embedding @ W_ih^T (row 0 stays 0 ->
                                       padding_idx=0 preserved)
    w_hh_ref   : (H, H)   f32,  VMEM   hidden->hidden weight, (in, out) layout
    w_lin_ref  : (H, C)   f32,  VMEM   head weight, (in, out) layout
    b_lin_ref  : (1, C)   f32,  VMEM   head bias
    returns    : (B, C)   f32 logits
    """
    B, S = batch, seq
    V, H = embp_ref.shape
    C = w_lin_ref.shape[1]

    emb = embp_ref[...]                                   # (V, H)
    w_hh = w_hh_ref[...]                                  # (H, H)
    w_lin = w_lin_ref[...]                                # (H, C)

    # --- Embedding gather as ONE one-hot contraction (off the serial chain).
    tok_col = tokcol_ref[...]                             # (S*B, 1) int32
    onehot = (lax.broadcasted_iota(jnp.int32, (S * B, V), 1)
              == tok_col).astype(jnp.float32)             # (S*B, V)
    xw_all = jnp.dot(onehot, emb,
                     preferred_element_type=jnp.float32)  # (S*B, H)

    # --- Hoist row slices/broadcasts out of the loops (no CSE for them).
    w_hh_rows = [jnp.broadcast_to(w_hh[k:k + 1, :], (B, H)) for k in range(H)]
    w_lin_rows = [jnp.broadcast_to(w_lin[k:k + 1, :], (B, C)) for k in range(H)]
    b_lin = jnp.broadcast_to(b_lin_ref[...], (B, C))

    # --- Recurrence: h stays in vregs; S static -> fully unrolled.  Per step:
    #     independent partial products + balanced add tree, then tanh (EUP).
    h = jnp.zeros((B, H), dtype=jnp.float32)
    for t in range(S):
        parts = [xw_all[t * B:(t + 1) * B, :]]
        parts += [h[:, k:k + 1] * w_hh_rows[k] for k in range(H)]
        h = jnp.tanh(_tree_sum(parts))

    # --- Linear head as VPU FMAs (avoids MXU latency on the serial tail).
    parts = [b_lin] + [h[:, k:k + 1] * w_lin_rows[k] for k in range(H)]
    return _tree_sum(parts)


def logits_kernel(tokcol_ref, embp_ref, w_hh_ref, w_lin_ref, b_lin_ref,
                  out_ref, *, batch, seq):
    out_ref[...] = _rnn_logits(tokcol_ref, embp_ref, w_hh_ref, w_lin_ref,
                               b_lin_ref, batch=batch, seq=seq)


def loss_kernel(tokcol_ref, y_ref, embp_ref, w_hh_ref, w_lin_ref, b_lin_ref,
                loss_ref, *, batch, seq):
    logits = _rnn_logits(tokcol_ref, embp_ref, w_hh_ref, w_lin_ref, b_lin_ref,
                         batch=batch, seq=seq)
    B, C = logits.shape
    # Fused cross-entropy (mean reduction) with integer targets.
    m = jnp.max(logits, axis=-1, keepdims=True)
    z = logits - m
    logp = z - jnp.log(jnp.sum(jnp.exp(z), axis=-1, keepdims=True))  # (B, C)
    # Labels live in SMEM; one compare+select per row (B is tiny).
    class_iota = lax.broadcasted_iota(jnp.int32, (1, C), 1)
    nll = jnp.zeros((1, 1), jnp.float32)
    for b in range(B):
        sel = jnp.where(class_iota == y_ref[b], logp[b:b + 1, :], 0.0)
        nll = nll - jnp.sum(sel, axis=-1, keepdims=True)
    loss_ref[...] = nll * (1.0 / B)


# ----------------------------------------------------------------------------
# Wrappers
# ----------------------------------------------------------------------------
def prepare_params(params):
    """Fold all per-call transposes / reshapes out of the forward path (once)."""
    # Embedding lookup is linear row selection: E[x] @ W_ih^T == (E @ W_ih^T)[x].
    emb_proj = params["embedding"] @ params["w_ih"].T      # (V, H); row 0 stays 0
    return {
        "emb_proj": emb_proj,                              # (V, H), lane-dense
        "w_hh_t": params["w_hh"].T,                        # (H, H) in->out
        "w_lin_t": params["w_lin"].T,                      # (H, C) in->out
        "b_lin_row": params["b_lin"][None, :],             # (1, C)
    }


def _tok_column(tokens):
    # (B, S) -> (S*B, 1) int32, time-major so each step's rows are a
    # contiguous sublane block inside the kernel.
    S_B = tokens.shape[0] * tokens.shape[1]
    return tokens.T.reshape(S_B, 1).astype(jnp.int32)


@jax.jit
def forward_logits(prep, tokens):
    B, S = tokens.shape
    kernel = functools.partial(logits_kernel, batch=B, seq=S)
    return pl.pallas_call(
        kernel,
        out_shape=jax.ShapeDtypeStruct((B, NUM_CLASSES), jnp.float32),
        in_specs=[_VMEM, _VMEM, _VMEM, _VMEM, _VMEM],
        out_specs=_VMEM,
    )(_tok_column(tokens), prep["emb_proj"], prep["w_hh_t"], prep["w_lin_t"],
      prep["b_lin_row"])


@jax.jit
def forward_loss(prep, tokens, y):
    B, S = tokens.shape
    kernel = functools.partial(loss_kernel, batch=B, seq=S)
    loss = pl.pallas_call(
        kernel,
        out_shape=jax.ShapeDtypeStruct((1, 1), jnp.float32),
        in_specs=[_VMEM, _SMEM, _VMEM, _VMEM, _VMEM, _VMEM],
        out_specs=_VMEM,
    )(_tok_column(tokens), y.astype(jnp.int32), prep["emb_proj"],
      prep["w_hh_t"], prep["w_lin_t"], prep["b_lin_row"])
    return loss[0, 0]


# ----------------------------------------------------------------------------
# Params + pure-JAX reference (for correctness check)
# ----------------------------------------------------------------------------
def init_params(key, vocab_size, vector_dim, hidden_size):
    k_emb, k_ih, k_hh, k_lw, k_lb = jax.random.split(key, 5)
    embedding = 0.1 * jax.random.normal(k_emb, (vocab_size, vector_dim),
                                        dtype=jnp.float32)
    embedding = embedding.at[0].set(0.0)             # padding_idx=0 row is zero
    return {
        "embedding": embedding,
        # PyTorch convention: (out_features, in_features)
        "w_ih": 0.1 * jax.random.normal(k_ih, (hidden_size, vector_dim),
                                        dtype=jnp.float32),
        "w_hh": 0.1 * jax.random.normal(k_hh, (hidden_size, hidden_size),
                                        dtype=jnp.float32),
        "w_lin": 0.1 * jax.random.normal(k_lw, (NUM_CLASSES, NUM_CLASSES),
                                         dtype=jnp.float32),
        "b_lin": 0.1 * jax.random.normal(k_lb, (NUM_CLASSES,),
                                         dtype=jnp.float32),
    }


def reference_forward(params, tokens, y=None):
    emb = params["embedding"][tokens]                         # (B, S, D)
    B, S, _D = emb.shape
    H = params["w_hh"].shape[0]
    h = jnp.zeros((B, H), jnp.float32)
    for t in range(S):
        h = jnp.tanh(emb[:, t, :] @ params["w_ih"].T + h @ params["w_hh"].T)
    logits = h @ params["w_lin"].T + params["b_lin"]
    if y is None:
        return logits
    logp = jax.nn.log_softmax(logits, axis=-1)
    return -jnp.mean(jnp.take_along_axis(logp, y[:, None], axis=-1))


# ----------------------------------------------------------------------------
if __name__ == "__main__":
    vocab_size = 27      # len(vocab)
    vector_dim = 32
    hidden_size = NUM_CLASSES  # forced by nn.Linear(5, 5) on the last hidden
    batch = 2
    seq_len = 8

    key = jax.random.PRNGKey(0)
    k_params, k_x, k_y = jax.random.split(key, 3)

    params = init_params(k_params, vocab_size, vector_dim, hidden_size)
    prep = prepare_params(params)

    x_tokens = jax.random.randint(k_x, (batch, seq_len), 0, vocab_size,
                                  dtype=jnp.int32)
    y_labels = jax.random.randint(k_y, (batch,), 0, NUM_CLASSES,
                                  dtype=jnp.int32)

    # Inference path (y=None) -> (B, 5) logits, single fused pallas_call.
    y_pred = jax.block_until_ready(forward_logits(prep, x_tokens))
    assert y_pred.shape == (batch, NUM_CLASSES)

    # Training path (y given) -> scalar cross-entropy loss, single fused call.
    loss = jax.block_until_ready(forward_loss(prep, x_tokens, y_labels))
    assert loss.shape == ()

    # Correctness vs. pure-JAX reference of the PyTorch forward.
    ref_logits = reference_forward(params, x_tokens)
    ref_loss = reference_forward(params, x_tokens, y_labels)
    assert jnp.allclose(y_pred, ref_logits, atol=1e-5, rtol=1e-5)
    assert jnp.allclose(loss, ref_loss, atol=1e-5, rtol=1e-5)

    print("KERNEL_OK")
</pallas_src>

<mosaic_0001>
module attributes {stable_mosaic.version = 11 : i64} {
  func.func @logits_kernel(%arg0: memref<16x1xi32, #tpu.memory_space<vmem>>, %arg1: memref<27x5xf32, #tpu.memory_space<vmem>>, %arg2: memref<5x5xf32, #tpu.memory_space<vmem>>, %arg3: memref<5x5xf32, #tpu.memory_space<vmem>>, %arg4: memref<1x5xf32, #tpu.memory_space<vmem>>, %arg5: memref<2x5xf32, #tpu.memory_space<vmem>>) attributes {dimension_semantics = [], scalar_prefetch = 0 : i64, scratch_operands = 0 : i64, tpu.core_type = #tpu.core_type<tc>} {
    %c0 = arith.constant 0 : index
    %c0_0 = arith.constant 0 : index
    %0 = vector.load %arg1[%c0, %c0_0] : memref<27x5xf32, #tpu.memory_space<vmem>>, vector<27x5xf32>
    %c0_1 = arith.constant 0 : index
    %c0_2 = arith.constant 0 : index
    %1 = vector.load %arg2[%c0_1, %c0_2] : memref<5x5xf32, #tpu.memory_space<vmem>>, vector<5x5xf32>
    %c0_3 = arith.constant 0 : index
    %c0_4 = arith.constant 0 : index
    %2 = vector.load %arg3[%c0_3, %c0_4] : memref<5x5xf32, #tpu.memory_space<vmem>>, vector<5x5xf32>
    %c0_5 = arith.constant 0 : index
    %c0_6 = arith.constant 0 : index
    %3 = vector.load %arg0[%c0_5, %c0_6] : memref<16x1xi32, #tpu.memory_space<vmem>>, vector<16x1xi32>
    %4 = tpu.iota {dimensions = array<i32: 1>} : vector<16x27xi32>
    %5 = vector.broadcast %3 : vector<16x1xi32> to vector<16x27xi32>
    %6 = arith.cmpi eq, %4, %5 : vector<16x27xi32>
    %7 = arith.extui %6 : vector<16x27xi1> to vector<16x27xi32>
    %8 = arith.sitofp %7 : vector<16x27xi32> to vector<16x27xf32>
    %cst = arith.constant dense<0.000000e+00> : vector<16x5xf32>
    %9 = tpu.matmul %8, %0, %cst {dimension_numbers = #tpu.dot_dimension_numbers<[1], [0], [0], [1], [0, 0, 1, 1], [], []>} : vector<16x27xf32>, vector<27x5xf32>, vector<16x5xf32> -> vector<16x5xf32>
    %10 = vector.extract_strided_slice %1 {offsets = [0, 0], sizes = [1, 5], strides = [1, 1]} : vector<5x5xf32> to vector<1x5xf32>
    %11 = vector.shape_cast %10 : vector<1x5xf32> to vector<1x5xf32>
    %12 = vector.broadcast %11 : vector<1x5xf32> to vector<2x5xf32>
    %13 = vector.extract_strided_slice %1 {offsets = [1, 0], sizes = [1, 5], strides = [1, 1]} : vector<5x5xf32> to vector<1x5xf32>
    %14 = vector.shape_cast %13 : vector<1x5xf32> to vector<1x5xf32>
    %15 = vector.broadcast %14 : vector<1x5xf32> to vector<2x5xf32>
    %16 = vector.extract_strided_slice %1 {offsets = [2, 0], sizes = [1, 5], strides = [1, 1]} : vector<5x5xf32> to vector<1x5xf32>
    %17 = vector.shape_cast %16 : vector<1x5xf32> to vector<1x5xf32>
    %18 = vector.broadcast %17 : vector<1x5xf32> to vector<2x5xf32>
    %19 = vector.extract_strided_slice %1 {offsets = [3, 0], sizes = [1, 5], strides = [1, 1]} : vector<5x5xf32> to vector<1x5xf32>
    %20 = vector.shape_cast %19 : vector<1x5xf32> to vector<1x5xf32>
    %21 = vector.broadcast %20 : vector<1x5xf32> to vector<2x5xf32>
    %22 = vector.extract_strided_slice %1 {offsets = [4, 0], sizes = [1, 5], strides = [1, 1]} : vector<5x5xf32> to vector<1x5xf32>
    %23 = vector.shape_cast %22 : vector<1x5xf32> to vector<1x5xf32>
    %24 = vector.broadcast %23 : vector<1x5xf32> to vector<2x5xf32>
    %25 = vector.extract_strided_slice %2 {offsets = [0, 0], sizes = [1, 5], strides = [1, 1]} : vector<5x5xf32> to vector<1x5xf32>
    %26 = vector.shape_cast %25 : vector<1x5xf32> to vector<1x5xf32>
    %27 = vector.broadcast %26 : vector<1x5xf32> to vector<2x5xf32>
    %28 = vector.extract_strided_slice %2 {offsets = [1, 0], sizes = [1, 5], strides = [1, 1]} : vector<5x5xf32> to vector<1x5xf32>
    %29 = vector.shape_cast %28 : vector<1x5xf32> to vector<1x5xf32>
    %30 = vector.broadcast %29 : vector<1x5xf32> to vector<2x5xf32>
    %31 = vector.extract_strided_slice %2 {offsets = [2, 0], sizes = [1, 5], strides = [1, 1]} : vector<5x5xf32> to vector<1x5xf32>
    %32 = vector.shape_cast %31 : vector<1x5xf32> to vector<1x5xf32>
    %33 = vector.broadcast %32 : vector<1x5xf32> to vector<2x5xf32>
    %34 = vector.extract_strided_slice %2 {offsets = [3, 0], sizes = [1, 5], strides = [1, 1]} : vector<5x5xf32> to vector<1x5xf32>
    %35 = vector.shape_cast %34 : vector<1x5xf32> to vector<1x5xf32>
    %36 = vector.broadcast %35 : vector<1x5xf32> to vector<2x5xf32>
    %37 = vector.extract_strided_slice %2 {offsets = [4, 0], sizes = [1, 5], strides = [1, 1]} : vector<5x5xf32> to vector<1x5xf32>
    %38 = vector.shape_cast %37 : vector<1x5xf32> to vector<1x5xf32>
    %39 = vector.broadcast %38 : vector<1x5xf32> to vector<2x5xf32>
    %c0_7 = arith.constant 0 : index
    %c0_8 = arith.constant 0 : index
    %40 = vector.load %arg4[%c0_7, %c0_8] : memref<1x5xf32, #tpu.memory_space<vmem>>, vector<1x5xf32>
    %41 = vector.shape_cast %40 : vector<1x5xf32> to vector<1x5xf32>
    %42 = vector.broadcast %41 : vector<1x5xf32> to vector<2x5xf32>
    %cst_9 = arith.constant 0.000000e+00 : f32
    %43 = vector.broadcast %cst_9 : f32 to vector<2x5xf32>
    %44 = vector.extract_strided_slice %9 {offsets = [0, 0], sizes = [2, 5], strides = [1, 1]} : vector<16x5xf32> to vector<2x5xf32>
    %45 = vector.extract_strided_slice %43 {offsets = [0, 0], sizes = [2, 1], strides = [1, 1]} : vector<2x5xf32> to vector<2x1xf32>
    %46 = vector.broadcast %45 : vector<2x1xf32> to vector<2x5xf32>
    %47 = arith.mulf %46, %12 : vector<2x5xf32>
    %48 = vector.extract_strided_slice %43 {offsets = [0, 1], sizes = [2, 1], strides = [1, 1]} : vector<2x5xf32> to vector<2x1xf32>
    %49 = vector.broadcast %48 : vector<2x1xf32> to vector<2x5xf32>
    %50 = arith.mulf %49, %15 : vector<2x5xf32>
    %51 = vector.extract_strided_slice %43 {offsets = [0, 2], sizes = [2, 1], strides = [1, 1]} : vector<2x5xf32> to vector<2x1xf32>
    %52 = vector.broadcast %51 : vector<2x1xf32> to vector<2x5xf32>
    %53 = arith.mulf %52, %18 : vector<2x5xf32>
    %54 = vector.extract_strided_slice %43 {offsets = [0, 3], sizes = [2, 1], strides = [1, 1]} : vector<2x5xf32> to vector<2x1xf32>
    %55 = vector.broadcast %54 : vector<2x1xf32> to vector<2x5xf32>
    %56 = arith.mulf %55, %21 : vector<2x5xf32>
    %57 = vector.extract_strided_slice %43 {offsets = [0, 4], sizes = [2, 1], strides = [1, 1]} : vector<2x5xf32> to vector<2x1xf32>
    %58 = vector.broadcast %57 : vector<2x1xf32> to vector<2x5xf32>
    %59 = arith.mulf %58, %24 : vector<2x5xf32>
    %60 = arith.addf %44, %47 : vector<2x5xf32>
    %61 = arith.addf %50, %53 : vector<2x5xf32>
    %62 = arith.addf %56, %59 : vector<2x5xf32>
    %63 = arith.addf %60, %61 : vector<2x5xf32>
    %64 = arith.addf %63, %62 : vector<2x5xf32>
    %65 = math.tanh %64 : vector<2x5xf32>
    %66 = vector.extract_strided_slice %9 {offsets = [2, 0], sizes = [2, 5], strides = [1, 1]} : vector<16x5xf32> to vector<2x5xf32>
    %67 = vector.extract_strided_slice %65 {offsets = [0, 0], sizes = [2, 1], strides = [1, 1]} : vector<2x5xf32> to vector<2x1xf32>
    %68 = vector.broadcast %67 : vector<2x1xf32> to vector<2x5xf32>
    %69 = arith.mulf %68, %12 : vector<2x5xf32>
    %70 = vector.extract_strided_slice %65 {offsets = [0, 1], sizes = [2, 1], strides = [1, 1]} : vector<2x5xf32> to vector<2x1xf32>
    %71 = vector.broadcast %70 : vector<2x1xf32> to vector<2x5xf32>
    %72 = arith.mulf %71, %15 : vector<2x5xf32>
    %73 = vector.extract_strided_slice %65 {offsets = [0, 2], sizes = [2, 1], strides = [1, 1]} : vector<2x5xf32> to vector<2x1xf32>
    %74 = vector.broadcast %73 : vector<2x1xf32> to vector<2x5xf32>
    %75 = arith.mulf %74, %18 : vector<2x5xf32>
    %76 = vector.extract_strided_slice %65 {offsets = [0, 3], sizes = [2, 1], strides = [1, 1]} : vector<2x5xf32> to vector<2x1xf32>
    %77 = vector.broadcast %76 : vector<2x1xf32> to vector<2x5xf32>
    %78 = arith.mulf %77, %21 : vector<2x5xf32>
    %79 = vector.extract_strided_slice %65 {offsets = [0, 4], sizes = [2, 1], strides = [1, 1]} : vector<2x5xf32> to vector<2x1xf32>
    %80 = vector.broadcast %79 : vector<2x1xf32> to vector<2x5xf32>
    %81 = arith.mulf %80, %24 : vector<2x5xf32>
    %82 = arith.addf %66, %69 : vector<2x5xf32>
    %83 = arith.addf %72, %75 : vector<2x5xf32>
    %84 = arith.addf %78, %81 : vector<2x5xf32>
    %85 = arith.addf %82, %83 : vector<2x5xf32>
    %86 = arith.addf %85, %84 : vector<2x5xf32>
    %87 = math.tanh %86 : vector<2x5xf32>
    %88 = vector.extract_strided_slice %9 {offsets = [4, 0], sizes = [2, 5], strides = [1, 1]} : vector<16x5xf32> to vector<2x5xf32>
    %89 = vector.extract_strided_slice %87 {offsets = [0, 0], sizes = [2, 1], strides = [1, 1]} : vector<2x5xf32> to vector<2x1xf32>
    %90 = vector.broadcast %89 : vector<2x1xf32> to vector<2x5xf32>
    %91 = arith.mulf %90, %12 : vector<2x5xf32>
    %92 = vector.extract_strided_slice %87 {offsets = [0, 1], sizes = [2, 1], strides = [1, 1]} : vector<2x5xf32> to vector<2x1xf32>
    %93 = vector.broadcast %92 : vector<2x1xf32> to vector<2x5xf32>
    %94 = arith.mulf %93, %15 : vector<2x5xf32>
    %95 = vector.extract_strided_slice %87 {offsets = [0, 2], sizes = [2, 1], strides = [1, 1]} : vector<2x5xf32> to vector<2x1xf32>
    %96 = vector.broadcast %95 : vector<2x1xf32> to vector<2x5xf32>
    %97 = arith.mulf %96, %18 : vector<2x5xf32>
    %98 = vector.extract_strided_slice %87 {offsets = [0, 3], sizes = [2, 1], strides = [1, 1]} : vector<2x5xf32> to vector<2x1xf32>
    %99 = vector.broadcast %98 : vector<2x1xf32> to vector<2x5xf32>
    %100 = arith.mulf %99, %21 : vector<2x5xf32>
    %101 = vector.extract_strided_slice %87 {offsets = [0, 4], sizes = [2, 1], strides = [1, 1]} : vector<2x5xf32> to vector<2x1xf32>
    %102 = vector.broadcast %101 : vector<2x1xf32> to vector<2x5xf32>
    %103 = arith.mulf %102, %24 : vector<2x5xf32>
    %104 = arith.addf %88, %91 : vector<2x5xf32>
    %105 = arith.addf %94, %97 : vector<2x5xf32>
    %106 = arith.addf %100, %103 : vector<2x5xf32>
    %107 = arith.addf %104, %105 : vector<2x5xf32>
    %108 = arith.addf %107, %106 : vector<2x5xf32>
    %109 = math.tanh %108 : vector<2x5xf32>
    %110 = vector.extract_strided_slice %9 {offsets = [6, 0], sizes = [2, 5], strides = [1, 1]} : vector<16x5xf32> to vector<2x5xf32>
    %111 = vector.extract_strided_slice %109 {offsets = [0, 0], sizes = [2, 1], strides = [1, 1]} : vector<2x5xf32> to vector<2x1xf32>
    %112 = vector.broadcast %111 : vector<2x1xf32> to vector<2x5xf32>
    %113 = arith.mulf %112, %12 : vector<2x5xf32>
    %114 = vector.extract_strided_slice %109 {offsets = [0, 1], sizes = [2, 1], strides = [1, 1]} : vector<2x5xf32> to vector<2x1xf32>
    %115 = vector.broadcast %114 : vector<2x1xf32> to vector<2x5xf32>
    %116 = arith.mulf %115, %15 : vector<2x5xf32>
    %117 = vector.extract_strided_slice %109 {offsets = [0, 2], sizes = [2, 1], strides = [1, 1]} : vector<2x5xf32> to vector<2x1xf32>
    %118 = vector.broadcast %117 : vector<2x1xf32> to vector<2x5xf32>
    %119 = arith.mulf %118, %18 : vector<2x5xf32>
    %120 = vector.extract_strided_slice %109 {offsets = [0, 3], sizes = [2, 1], strides = [1, 1]} : vector<2x5xf32> to vector<2x1xf32>
    %121 = vector.broadcast %120 : vector<2x1xf32> to vector<2x5xf32>
    %122 = arith.mulf %121, %21 : vector<2x5xf32>
    %123 = vector.extract_strided_slice %109 {offsets = [0, 4], sizes = [2, 1], strides = [1, 1]} : vector<2x5xf32> to vector<2x1xf32>
    %124 = vector.broadcast %123 : vector<2x1xf32> to vector<2x5xf32>
    %125 = arith.mulf %124, %24 : vector<2x5xf32>
    %126 = arith.addf %110, %113 : vector<2x5xf32>
    %127 = arith.addf %116, %119 : vector<2x5xf32>
    %128 = arith.addf %122, %125 : vector<2x5xf32>
    %129 = arith.addf %126, %127 : vector<2x5xf32>
    %130 = arith.addf %129, %128 : vector<2x5xf32>
    %131 = math.tanh %130 : vector<2x5xf32>
    %132 = vector.extract_strided_slice %9 {offsets = [8, 0], sizes = [2, 5], strides = [1, 1]} : vector<16x5xf32> to vector<2x5xf32>
    %133 = vector.extract_strided_slice %131 {offsets = [0, 0], sizes = [2, 1], strides = [1, 1]} : vector<2x5xf32> to vector<2x1xf32>
    %134 = vector.broadcast %133 : vector<2x1xf32> to vector<2x5xf32>
    %135 = arith.mulf %134, %12 : vector<2x5xf32>
    %136 = vector.extract_strided_slice %131 {offsets = [0, 1], sizes = [2, 1], strides = [1, 1]} : vector<2x5xf32> to vector<2x1xf32>
    %137 = vector.broadcast %136 : vector<2x1xf32> to vector<2x5xf32>
    %138 = arith.mulf %137, %15 : vector<2x5xf32>
    %139 = vector.extract_strided_slice %131 {offsets = [0, 2], sizes = [2, 1], strides = [1, 1]} : vector<2x5xf32> to vector<2x1xf32>
    %140 = vector.broadcast %139 : vector<2x1xf32> to vector<2x5xf32>
    %141 = arith.mulf %140, %18 : vector<2x5xf32>
    %142 = vector.extract_strided_slice %131 {offsets = [0, 3], sizes = [2, 1], strides = [1, 1]} : vector<2x5xf32> to vector<2x1xf32>
    %143 = vector.broadcast %142 : vector<2x1xf32> to vector<2x5xf32>
    %144 = arith.mulf %143, %21 : vector<2x5xf32>
    %145 = vector.extract_strided_slice %131 {offsets = [0, 4], sizes = [2, 1], strides = [1, 1]} : vector<2x5xf32> to vector<2x1xf32>
    %146 = vector.broadcast %145 : vector<2x1xf32> to vector<2x5xf32>
    %147 = arith.mulf %146, %24 : vector<2x5xf32>
    %148 = arith.addf %132, %135 : vector<2x5xf32>
    %149 = arith.addf %138, %141 : vector<2x5xf32>
    %150 = arith.addf %144, %147 : vector<2x5xf32>
    %151 = arith.addf %148, %149 : vector<2x5xf32>
    %152 = arith.addf %151, %150 : vector<2x5xf32>
    %153 = math.tanh %152 : vector<2x5xf32>
    %154 = vector.extract_strided_slice %9 {offsets = [10, 0], sizes = [2, 5], strides = [1, 1]} : vector<16x5xf32> to vector<2x5xf32>
    %155 = vector.extract_strided_slice %153 {offsets = [0, 0], sizes = [2, 1], strides = [1, 1]} : vector<2x5xf32> to vector<2x1xf32>
    %156 = vector.broadcast %155 : vector<2x1xf32> to vector<2x5xf32>
    %157 = arith.mulf %156, %12 : vector<2x5xf32>
    %158 = vector.extract_strided_slice %153 {offsets = [0, 1], sizes = [2, 1], strides = [1, 1]} : vector<2x5xf32> to vector<2x1xf32>
    %159 = vector.broadcast %158 : vector<2x1xf32> to vector<2x5xf32>
    %160 = arith.mulf %159, %15 : vector<2x5xf32>
    %161 = vector.extract_strided_slice %153 {offsets = [0, 2], sizes = [2, 1], strides = [1, 1]} : vector<2x5xf32> to vector<2x1xf32>
    %162 = vector.broadcast %161 : vector<2x1xf32> to vector<2x5xf32>
    %163 = arith.mulf %162, %18 : vector<2x5xf32>
    %164 = vector.extract_strided_slice %153 {offsets = [0, 3], sizes = [2, 1], strides = [1, 1]} : vector<2x5xf32> to vector<2x1xf32>
    %165 = vector.broadcast %164 : vector<2x1xf32> to vector<2x5xf32>
    %166 = arith.mulf %165, %21 : vector<2x5xf32>
    %167 = vector.extract_strided_slice %153 {offsets = [0, 4], sizes = [2, 1], strides = [1, 1]} : vector<2x5xf32> to vector<2x1xf32>
    %168 = vector.broadcast %167 : vector<2x1xf32> to vector<2x5xf32>
    %169 = arith.mulf %168, %24 : vector<2x5xf32>
    %170 = arith.addf %154, %157 : vector<2x5xf32>
    %171 = arith.addf %160, %163 : vector<2x5xf32>
    %172 = arith.addf %166, %169 : vector<2x5xf32>
    %173 = arith.addf %170, %171 : vector<2x5xf32>
    %174 = arith.addf %173, %172 : vector<2x5xf32>
    %175 = math.tanh %174 : vector<2x5xf32>
    %176 = vector.extract_strided_slice %9 {offsets = [12, 0], sizes = [2, 5], strides = [1, 1]} : vector<16x5xf32> to vector<2x5xf32>
    %177 = vector.extract_strided_slice %175 {offsets = [0, 0], sizes = [2, 1], strides = [1, 1]} : vector<2x5xf32> to vector<2x1xf32>
    %178 = vector.broadcast %177 : vector<2x1xf32> to vector<2x5xf32>
    %179 = arith.mulf %178, %12 : vector<2x5xf32>
    %180 = vector.extract_strided_slice %175 {offsets = [0, 1], sizes = [2, 1], strides = [1, 1]} : vector<2x5xf32> to vector<2x1xf32>
    %181 = vector.broadcast %180 : vector<2x1xf32> to vector<2x5xf32>
    %182 = arith.mulf %181, %15 : vector<2x5xf32>
    %183 = vector.extract_strided_slice %175 {offsets = [0, 2], sizes = [2, 1], strides = [1, 1]} : vector<2x5xf32> to vector<2x1xf32>
    %184 = vector.broadcast %183 : vector<2x1xf32> to vector<2x5xf32>
    %185 = arith.mulf %184, %18 : vector<2x5xf32>
    %186 = vector.extract_strided_slice %175 {offsets = [0, 3], sizes = [2, 1], strides = [1, 1]} : vector<2x5xf32> to vector<2x1xf32>
    %187 = vector.broadcast %186 : vector<2x1xf32> to vector<2x5xf32>
    %188 = arith.mulf %187, %21 : vector<2x5xf32>
    %189 = vector.extract_strided_slice %175 {offsets = [0, 4], sizes = [2, 1], strides = [1, 1]} : vector<2x5xf32> to vector<2x1xf32>
    %190 = vector.broadcast %189 : vector<2x1xf32> to vector<2x5xf32>
    %191 = arith.mulf %190, %24 : vector<2x5xf32>
    %192 = arith.addf %176, %179 : vector<2x5xf32>
    %193 = arith.addf %182, %185 : vector<2x5xf32>
    %194 = arith.addf %188, %191 : vector<2x5xf32>
    %195 = arith.addf %192, %193 : vector<2x5xf32>
    %196 = arith.addf %195, %194 : vector<2x5xf32>
    %197 = math.tanh %196 : vector<2x5xf32>
    %198 = vector.extract_strided_slice %9 {offsets = [14, 0], sizes = [2, 5], strides = [1, 1]} : vector<16x5xf32> to vector<2x5xf32>
    %199 = vector.extract_strided_slice %197 {offsets = [0, 0], sizes = [2, 1], strides = [1, 1]} : vector<2x5xf32> to vector<2x1xf32>
    %200 = vector.broadcast %199 : vector<2x1xf32> to vector<2x5xf32>
    %201 = arith.mulf %200, %12 : vector<2x5xf32>
    %202 = vector.extract_strided_slice %197 {offsets = [0, 1], sizes = [2, 1], strides = [1, 1]} : vector<2x5xf32> to vector<2x1xf32>
    %203 = vector.broadcast %202 : vector<2x1xf32> to vector<2x5xf32>
    %204 = arith.mulf %203, %15 : vector<2x5xf32>
    %205 = vector.extract_strided_slice %197 {offsets = [0, 2], sizes = [2, 1], strides = [1, 1]} : vector<2x5xf32> to vector<2x1xf32>
    %206 = vector.broadcast %205 : vector<2x1xf32> to vector<2x5xf32>
    %207 = arith.mulf %206, %18 : vector<2x5xf32>
    %208 = vector.extract_strided_slice %197 {offsets = [0, 3], sizes = [2, 1], strides = [1, 1]} : vector<2x5xf32> to vector<2x1xf32>
    %209 = vector.broadcast %208 : vector<2x1xf32> to vector<2x5xf32>
    %210 = arith.mulf %209, %21 : vector<2x5xf32>
    %211 = vector.extract_strided_slice %197 {offsets = [0, 4], sizes = [2, 1], strides = [1, 1]} : vector<2x5xf32> to vector<2x1xf32>
    %212 = vector.broadcast %211 : vector<2x1xf32> to vector<2x5xf32>
    %213 = arith.mulf %212, %24 : vector<2x5xf32>
    %214 = arith.addf %198, %201 : vector<2x5xf32>
    %215 = arith.addf %204, %207 : vector<2x5xf32>
    %216 = arith.addf %210, %213 : vector<2x5xf32>
    %217 = arith.addf %214, %215 : vector<2x5xf32>
    %218 = arith.addf %217, %216 : vector<2x5xf32>
    %219 = math.tanh %218 : vector<2x5xf32>
    %220 = vector.extract_strided_slice %219 {offsets = [0, 0], sizes = [2, 1], strides = [1, 1]} : vector<2x5xf32> to vector<2x1xf32>
    %221 = vector.broadcast %220 : vector<2x1xf32> to vector<2x5xf32>
    %222 = arith.mulf %221, %27 : vector<2x5xf32>
    %223 = vector.extract_strided_slice %219 {offsets = [0, 1], sizes = [2, 1], strides = [1, 1]} : vector<2x5xf32> to vector<2x1xf32>
    %224 = vector.broadcast %223 : vector<2x1xf32> to vector<2x5xf32>
    %225 = arith.mulf %224, %30 : vector<2x5xf32>
    %226 = vector.extract_strided_slice %219 {offsets = [0, 2], sizes = [2, 1], strides = [1, 1]} : vector<2x5xf32> to vector<2x1xf32>
    %227 = vector.broadcast %226 : vector<2x1xf32> to vector<2x5xf32>
    %228 = arith.mulf %227, %33 : vector<2x5xf32>
    %229 = vector.extract_strided_slice %219 {offsets = [0, 3], sizes = [2, 1], strides = [1, 1]} : vector<2x5xf32> to vector<2x1xf32>
    %230 = vector.broadcast %229 : vector<2x1xf32> to vector<2x5xf32>
    %231 = arith.mulf %230, %36 : vector<2x5xf32>
    %232 = vector.extract_strided_slice %219 {offsets = [0, 4], sizes = [2, 1], strides = [1, 1]} : vector<2x5xf32> to vector<2x1xf32>
    %233 = vector.broadcast %232 : vector<2x1xf32> to vector<2x5xf32>
    %234 = arith.mulf %233, %39 : vector<2x5xf32>
    %235 = arith.addf %42, %222 : vector<2x5xf32>
    %236 = arith.addf %225, %228 : vector<2x5xf32>
    %237 = arith.addf %231, %234 : vector<2x5xf32>
    %238 = arith.addf %235, %236 : vector<2x5xf32>
    %239 = arith.addf %238, %237 : vector<2x5xf32>
    %c0_10 = arith.constant 0 : index
    %c0_11 = arith.constant 0 : index
    %240 = vector.load %arg5[%c0_10, %c0_11] : memref<2x5xf32, #tpu.memory_space<vmem>>, vector<2x5xf32>
    tpu.vector_store %arg5[%c0_10, %c0_11], %239 {strides = array<i32>} : memref<2x5xf32, #tpu.memory_space<vmem>>, vector<2x5xf32>,
    return
  }
}

</mosaic_0001>

<bundles_post_ra>
// kernel: forward_logits.1
= control target key start
LH: loop header
LB: loop body
LE: loop exit
PB: predicated region body
PF: predicated region fallthrough
CT: control target
= control target key end

     0   :  { %vm50_vm0 = vcmask 1042432   ;;  %v533_v3 = vmov 0   ;;  %s700_s0 = inlined_call_operand.vmem [shape: s32[16,1], index: 0, kind: input, shape index: {}]   ;;  %s701_s1 = inlined_call_operand.vmem [shape: f32[27,5], index: 1, kind: input, shape index: {}]   ;;  %s702_s2 = inlined_call_operand.vmem [shape: f32[5,5], index: 2, kind: input, shape index: {}]   ;;  %s703_s3 = inlined_call_operand.vmem [shape: f32[5,5], index: 3, kind: input, shape index: {}]   ;;  %s704_s4 = inlined_call_operand.vmem [shape: f32[1,5], index: 4, kind: input, shape index: {}]   ;;  %s705_s5 = inlined_call_operand.hbm [shape: f32[2,5], index: 5, kind: output, shape index: {}]  }
   0x1   :  { %v27_v0 = vld [vmem:[%s700_s0] sm:$0xff]  ;;  %v24_v1 = vld [vmem:[%s701_s1 + $0x18] sm:$0x7]  ;;  %v23_v2 = vld [vmem:[%s701_s1 + $0x10] sm:$0xff]  ;;  %454 = vset.pattern.permute.xlu0 %v533_v3 }
   0x2   :  { %440 = vmatpush.msk.msra.mxu0 %vm50_vm0, %v24_v1 }
   0x3   :  { %10 = vsyncpa [#allocation3], 0  ;;  %32 = vperm.xlu0 %454, %v27_v0   ;;  %443 = vmatpush.msk.msra.mxu1 %vm50_vm0, %v24_v1  ;;  %v22_v4 = vld [vmem:[%s701_s1 + $0x8] sm:$0xff]  ;;  %v21_v5 = vld [vmem:[%s701_s1] sm:$0xff]  ;;  %v29_v6 = vlaneseq  ;;  %vm43_vm1 = vcmask 220160   ;;  %v534_v9 = vmov 0.0  }
   0x4   :  { %67 = vmatpush.msra.mxu0 %v23_v2  ;;  %v535_v11 = vmov 3   ;;  %v536_v12 = vmov 1   ;;  %v25_v13 = vld [vmem:[%s702_s2] sm:$0x1f]  ;;  %v28_v31 = vld [vmem:[%s700_s0 + $0x8] sm:$0xff]  ;;  %v537_v32 = vmov 4  }
   0x5   :  { %444 = vmatpush.msra.mxu1 %v23_v2  ;;  %v30_v7 = vand.u32 127, %v29_v6  ;;  %457 = vset.pattern.permute.xlu2 %v535_v11  ;;  %v592_v14 = vperm.slane %v25_v13, 1  ;;  %v594_v15 = vperm.slane %v25_v13, 2  ;;  %v596_v16 = vperm.slane %v25_v13, 0  ;;  %s429_s11 = sshll.u32 %s705_s5, 4  ;;  %s430_s11 = int_to_ptr.hbm [resolvable:$true] %s429_s11 }
   0x6   :  { %68 = vmatpush.msra.mxu0 %v22_v4  ;;  %455 = vset.pattern.permute.xlu1 %v536_v12  ;;  %v598_v17 = vperm.slane %v25_v13, 3  ;;  %v600_v18 = vperm.slane %v25_v13, 4  ;;  %v538_v33 = vmov 2   ;;  %vm420_vm4 = vcmask 39942  }
   0x7   :  { %445 = vmatpush.msra.mxu1 %v22_v4  ;;  %v92_v19 = vmul.f32 0.0, %v592_v14  ;;  %v93_v20 = vmul.f32 0.0, %v594_v15  ;;  %v91_v21 = vmul.f32 0.0, %v596_v16 }
   0x8   :  { %69 = vmatpush.msra.mxu0 %v21_v5  ;;  %v94_v22 = vmul.f32 0.0, %v598_v17  ;;  %v95_v23 = vmul.f32 0.0, %v600_v18 }
   0x9   :  { %446 = vmatpush.msra.mxu1 %v21_v5  ;;  %v97_v24 = vadd.f32 %v93_v20, %v92_v19 }
   0xa   :  { %v98_v27 = vadd.f32 %v95_v23, %v94_v22 }
  0x75   :  { %v33_v8 = vpop.permute.xlu0 %32 }
  0x76   :  { %vm37_vm2 = vcmp.eq.s32.totalorder %v30_v7, %v33_v8 }
  0x77   :  { %v438_v10 = vsel %vm37_vm2, 1.0, %v534_v9 }
  0x78   :  { %441 = vmatmul.msk.f32.vlgmr.msra.gmra.mxu0 %vm43_vm1, %v438_v10 }
  0xf5   :  { %v607_v25 = vpop.f32.mrf.mxu0 }
  0xf6   :  { %v96_v26 = vadd.f32 %v91_v21, %v607_v25 }
  0xf8   :  { %v99_v28 = vadd.f32 %v97_v24, %v96_v26 }
  0xfa   :  { %v100_v29 = vadd.f32 %v99_v28, %v98_v27 }
  0xfc   :  { %491 = vtanh.f32 %v100_v29 }
 0x102   :  { %v492_v30 = vpop.eup %491 }
 0x103   :  { %119 = vperm.xlu2 %457, %v492_v30   ;;  %109 = vperm.xlu1 %455, %v492_v30  }
 0x104   :  { %104 = vperm.xlu0 %454, %v492_v30  }
 0x10b   :  { %458 = vset.pattern.permute.xlu2 %v537_v32  ;;  %456 = vset.pattern.permute.xlu1 %v538_v33 }
 0x10c   :  { %35 = vperm.xlu0 %454, %v28_v31   ;;  %124 = vperm.xlu2 %458, %v492_v30  }
 0x10d   :  { %114 = vperm.xlu1 %456, %v492_v30  }
 0x114   :  { %460 = vset.pattern.permute.xlu2 %v536_v12  ;;  %461 = vset.pattern.permute.xlu0 %v538_v33 }
 0x115   :  { %459 = vset.pattern.permute.xlu1 %v533_v3 }
 0x15d   :  { %v120_v34 = vpop.permute.xlu2 %119 }
 0x15e   :  { %v122_v41 = vmul.f32 %v120_v34, %v598_v17 }
 0x166   :  { %v125_v37 = vpop.permute.xlu2 %124 }
 0x167   :  { %v127_v39 = vmul.f32 %v125_v37, %v600_v18 }
 0x169   :  { %v133_v47 = vadd.f32 %v127_v39, %v122_v41 }
 0x16b   :  { %v139_v51 = vrot.slane %v133_v47, 6 }
 0x175   :  { %v110_v35 = vpop.permute.xlu1 %109 }
 0x176   :  { %v105_v36 = vpop.permute.xlu0 %104  ;;  %v112_v43 = vmul.f32 %v110_v35, %v592_v14 }
 0x177   :  { %v107_v38 = vmul.f32 %v105_v36, %v596_v16 }
 0x179   :  { %v129_v44 = vrot.slane %v107_v38, 6 }
 0x17b   :  { %v131_v49 = vadd.f32 %v129_v44, %v607_v25 }
 0x17e   :  { %v36_v40 = vpop.permute.xlu0 %35 }
 0x17f   :  { %vm38_vm3 = vcmp.eq.s32.totalorder %v30_v7, %v36_v40  ;;  %v115_v42 = vpop.permute.xlu1 %114 }
 0x180   :  { %v439_v45 = vsel %vm38_vm3, 1.0, %v534_v9  ;;  %v117_v46 = vmul.f32 %v115_v42, %v594_v15 }
 0x181   :  { %442 = vmatmul.msk.f32.vlgmr.msra.gmra.mxu1 %vm43_vm1, %v439_v45 }
 0x182   :  { %v132_v48 = vadd.f32 %v117_v46, %v112_v43 }
 0x184   :  { %v135_v50 = vrot.slane %v132_v48, 6 }
 0x186   :  { %v137_v52 = vadd.f32 %v135_v50, %v131_v49 }
 0x188   :  { %v141_v53 = vadd.f32 %v139_v51, %v137_v52 }
 0x18a   :  { %493 = vtanh.f32 %v141_v53 }
 0x190   :  { %v494_v54 = vpop.eup %493 }
 0x191   :  { %155 = vperm.xlu0 %461, %v494_v54   ;;  %150 = vperm.xlu2 %460, %v494_v54  }
 0x192   :  { %145 = vperm.xlu1 %459, %v494_v54  }
 0x199   :  { %463 = vset.pattern.permute.xlu2 %v537_v32 }
 0x19a   :  { %462 = vset.pattern.permute.xlu1 %v535_v11  ;;  %165 = vperm.xlu2 %463, %v494_v54  }
 0x19b   :  { %160 = vperm.xlu1 %462, %v494_v54  }
 0x1a2   :  { %465 = vset.pattern.permute.xlu2 %v536_v12 }
 0x1a3   :  { %464 = vset.pattern.permute.xlu1 %v533_v3 }
 0x1eb   :  { %v151_v55 = vpop.permute.xlu2 %150 }
 0x1ec   :  { %v153_v60 = vmul.f32 %v151_v55, %v592_v14 }
 0x1f4   :  { %v166_v63 = vpop.permute.xlu2 %165 }
 0x1f5   :  { %v168_v1 = vmul.f32 %v166_v63, %v600_v18 }
 0x1fe   :  { %v653_v48 = vpop.f32.mrf.mxu1 }
 0x203   :  { %v156_v56 = vpop.permute.xlu0 %155 }
 0x204   :  { %v146_v57 = vpop.permute.xlu1 %145  ;;  %v158_v59 = vmul.f32 %v156_v56, %v594_v15 }
 0x205   :  { %v148_v58 = vmul.f32 %v146_v57, %v596_v16 }
 0x206   :  { %v173_v62 = vadd.f32 %v158_v59, %v153_v60 }
 0x207   :  { %v170_v61 = vrot.slane %v148_v58, 6 }
 0x208   :  { %v176_v4 = vrot.slane %v173_v62, 6 }
 0x209   :  { %v172_v2 = vadd.f32 %v170_v61, %v607_v25 }
 0x20b   :  { %v178_v7 = vadd.f32 %v176_v4, %v172_v2 }
 0x20d   :  { %v161_v0 = vpop.permute.xlu1 %160 }
 0x20e   :  { %v163_v5 = vmul.f32 %v161_v0, %v598_v17 }
 0x210   :  { %v174_v6 = vadd.f32 %v168_v1, %v163_v5 }
 0x212   :  { %v180_v8 = vrot.slane %v174_v6, 6 }
 0x214   :  { %v182_v9 = vadd.f32 %v180_v8, %v178_v7 }
 0x216   :  { %495 = vtanh.f32 %v182_v9 }
 0x21c   :  { %v496_v10 = vpop.eup %495 }
 0x21d   :  { %196 = vperm.xlu0 %461, %v496_v10   ;;  %191 = vperm.xlu2 %465, %v496_v10  }
 0x21e   :  { %186 = vperm.xlu1 %464, %v496_v10  }
 0x225   :  { %467 = vset.pattern.permute.xlu2 %v537_v32  ;;  %468 = vset.pattern.permute.xlu0 %v533_v3 }
 0x226   :  { %466 = vset.pattern.permute.xlu1 %v535_v11  ;;  %206 = vperm.xlu2 %467, %v496_v10  }
 0x227   :  { %201 = vperm.xlu1 %466, %v496_v10  }
 0x22e   :  { %470 = vset.pattern.permute.xlu2 %v538_v33 }
 0x22f   :  { %469 = vset.pattern.permute.xlu1 %v536_v12 }
 0x277   :  { %v192_v13 = vpop.permute.xlu2 %191 }
 0x278   :  { %v194_v23 = vmul.f32 %v192_v13, %v592_v14 }
 0x280   :  { %v207_v27 = vpop.permute.xlu2 %206 }
 0x281   :  { %v209_v29 = vmul.f32 %v207_v27, %v600_v18 }
 0x28f   :  { %v197_v19 = vpop.permute.xlu0 %196 }
 0x290   :  { %v187_v20 = vpop.permute.xlu1 %186  ;;  %v199_v21 = vmul.f32 %v197_v19, %v594_v15 }
 0x291   :  { %v189_v22 = vmul.f32 %v187_v20, %v596_v16 }
 0x292   :  { %v214_v24 = vadd.f32 %v199_v21, %v194_v23 }
 0x293   :  { %v211_v26 = vrot.slane %v189_v22, 6 }
 0x294   :  { %v217_v30 = vrot.slane %v214_v24, 6 }
 0x295   :  { %v213_v31 = vadd.f32 %v211_v26, %v607_v25 }
 0x297   :  { %v219_v36 = vadd.f32 %v217_v30, %v213_v31 }
 0x299   :  { %v202_v28 = vpop.permute.xlu1 %201 }
 0x29a   :  { %v204_v34 = vmul.f32 %v202_v28, %v598_v17 }
 0x29c   :  { %v215_v35 = vadd.f32 %v209_v29, %v204_v34 }
 0x29e   :  { %v221_v37 = vrot.slane %v215_v35, 6 }
 0x2a0   :  { %v223_v38 = vadd.f32 %v221_v37, %v219_v36 }
 0x2a2   :  { %497 = vtanh.f32 %v223_v38 }
 0x2a8   :  { %v498_v39 = vpop.eup %497 }
 0x2a9   :  { %237 = vperm.xlu2 %470, %v498_v39   ;;  %232 = vperm.xlu1 %469, %v498_v39  }
 0x2aa   :  { %227 = vperm.xlu0 %468, %v498_v39  }
 0x2b1   :  { %472 = vset.pattern.permute.xlu2 %v537_v32  ;;  %471 = vset.pattern.permute.xlu1 %v535_v11 }
 0x2b2   :  { %247 = vperm.xlu2 %472, %v498_v39   ;;  %242 = vperm.xlu1 %471, %v498_v39  }
 0x2ba   :  { %474 = vset.pattern.permute.xlu2 %v538_v33  ;;  %473 = vset.pattern.permute.xlu1 %v536_v12 }
 0x303   :  { %v238_v25 = vpop.permute.xlu2 %237 }
 0x304   :  { %v240_v44 = vmul.f32 %v238_v25, %v594_v15 }
 0x30c   :  { %v248_v47 = vpop.permute.xlu2 %247 }
 0x30d   :  { %v250_v50 = vmul.f32 %v248_v47, %v600_v18 }
 0x31b   :  { %v233_v40 = vpop.permute.xlu1 %232 }
 0x31c   :  { %v228_v41 = vpop.permute.xlu0 %227  ;;  %v235_v42 = vmul.f32 %v233_v40, %v592_v14 }
 0x31d   :  { %v230_v43 = vmul.f32 %v228_v41, %v596_v16 }
 0x31e   :  { %v255_v45 = vadd.f32 %v240_v44, %v235_v42 }
 0x31f   :  { %v252_v46 = vrot.slane %v230_v43, 6 }
 0x320   :  { %v258_v51 = vrot.slane %v255_v45, 6 }
 0x321   :  { %v254_v52 = vadd.f32 %v252_v46, %v653_v48 }
 0x323   :  { %v260_v55 = vadd.f32 %v258_v51, %v254_v52 }
 0x324   :  { %v243_v49 = vpop.permute.xlu1 %242 }
 0x325   :  { %v245_v53 = vmul.f32 %v243_v49, %v598_v17 }
 0x327   :  { %v256_v54 = vadd.f32 %v250_v50, %v245_v53 }
 0x329   :  { %v262_v56 = vrot.slane %v256_v54, 6 }
 0x32b   :  { %v264_v57 = vadd.f32 %v262_v56, %v260_v55 }
 0x32d   :  { %499 = vtanh.f32 %v264_v57 }
 0x333   :  { %v500_v58 = vpop.eup %499 }
 0x334   :  { %278 = vperm.xlu2 %474, %v500_v58   ;;  %273 = vperm.xlu1 %473, %v500_v58  }
 0x335   :  { %268 = vperm.xlu0 %468, %v500_v58  }
 0x33c   :  { %476 = vset.pattern.permute.xlu1 %v537_v32  ;;  %477 = vset.pattern.permute.xlu2 %v533_v3 }
 0x33d   :  { %475 = vset.pattern.permute.xlu0 %v535_v11  ;;  %288 = vperm.xlu1 %476, %v500_v58  }
 0x33e   :  { %283 = vperm.xlu0 %475, %v500_v58  }
 0x345   :  { %478 = vset.pattern.permute.xlu1 %v536_v12 }
 0x38e   :  { %v279_v61 = vpop.permute.xlu2 %278 }
 0x38f   :  { %v281_v0 = vmul.f32 %v279_v61, %v594_v15 }
 0x3a6   :  { %v274_v59 = vpop.permute.xlu1 %273 }
 0x3a7   :  { %v269_v60 = vpop.permute.xlu0 %268  ;;  %v276_v62 = vmul.f32 %v274_v59, %v592_v14 }
 0x3a8   :  { %v271_v63 = vmul.f32 %v269_v60, %v596_v16 }
 0x3a9   :  { %v296_v1 = vadd.f32 %v281_v0, %v276_v62 }
 0x3aa   :  { %v293_v2 = vrot.slane %v271_v63, 6 }
 0x3ab   :  { %v299_v7 = vrot.slane %v296_v1, 6 }
 0x3ac   :  { %v295_v8 = vadd.f32 %v293_v2, %v653_v48 }
 0x3ae   :  { %v301_v13 = vadd.f32 %v299_v7, %v295_v8 }
 0x3af   :  { %v289_v4 = vpop.permute.xlu1 %288 }
 0x3b0   :  { %v291_v5 = vmul.f32 %v289_v4, %v600_v18  ;;  %v284_v6 = vpop.permute.xlu0 %283 }
 0x3b1   :  { %v286_v9 = vmul.f32 %v284_v6, %v598_v17 }
 0x3b3   :  { %v297_v10 = vadd.f32 %v291_v5, %v286_v9 }
 0x3b5   :  { %v303_v19 = vrot.slane %v297_v10, 6 }
 0x3b7   :  { %v305_v20 = vadd.f32 %v303_v19, %v301_v13 }
 0x3b9   :  { %501 = vtanh.f32 %v305_v20 }
 0x3bf   :  { %v502_v21 = vpop.eup %501 }
 0x3c0   :  { %324 = vperm.xlu0 %475, %v502_v21   ;;  %314 = vperm.xlu1 %478, %v502_v21  }
 0x3c1   :  { %309 = vperm.xlu2 %477, %v502_v21  }
 0x3c8   :  { %480 = vset.pattern.permute.xlu1 %v537_v32  ;;  %482 = vset.pattern.permute.xlu0 %v536_v12 }
 0x3c9   :  { %479 = vset.pattern.permute.xlu2 %v538_v33  ;;  %329 = vperm.xlu1 %480, %v502_v21  }
 0x3ca   :  { %319 = vperm.xlu2 %479, %v502_v21  }
 0x3d1   :  { %483 = vset.pattern.permute.xlu1 %v538_v33 }
 0x3d2   :  { %481 = vset.pattern.permute.xlu2 %v533_v3 }
 0x41b   :  { %v310_v22 = vpop.permute.xlu2 %309 }
 0x41c   :  { %v312_v27 = vmul.f32 %v310_v22, %v596_v16 }
 0x41e   :  { %v334_v12 = vrot.slane %v312_v27, 6 }
 0x420   :  { %v336_v37 = vadd.f32 %v334_v12, %v653_v48 }
 0x424   :  { %v320_v24 = vpop.permute.xlu2 %319 }
 0x425   :  { %v322_v28 = vmul.f32 %v320_v24, %v594_v15 }
 0x432   :  { %v315_v23 = vpop.permute.xlu1 %314  ;;  %v325_v30 = vpop.permute.xlu0 %324 }
 0x433   :  { %v317_v26 = vmul.f32 %v315_v23, %v592_v14  ;;  %v327_v34 = vmul.f32 %v325_v30, %v598_v17 }
 0x435   :  { %v337_v29 = vadd.f32 %v322_v28, %v317_v26 }
 0x437   :  { %v340_v35 = vrot.slane %v337_v29, 6 }
 0x439   :  { %v342_v39 = vadd.f32 %v340_v35, %v336_v37 }
 0x43b   :  { %v330_v31 = vpop.permute.xlu1 %329 }
 0x43c   :  { %v332_v36 = vmul.f32 %v330_v31, %v600_v18 }
 0x43e   :  { %v338_v38 = vadd.f32 %v332_v36, %v327_v34 }
 0x440   :  { %v344_v25 = vrot.slane %v338_v38, 6 }
 0x442   :  { %v346_v40 = vadd.f32 %v344_v25, %v342_v39 }
 0x444   :  { %503 = vtanh.f32 %v346_v40 }
 0x44a   :  { %v504_v41 = vpop.eup %503 }
 0x44b   :  { %360 = vperm.xlu1 %483, %v504_v41   ;;  %355 = vperm.xlu0 %482, %v504_v41  }
 0x44c   :  { %350 = vperm.xlu2 %481, %v504_v41  }
 0x453   :  { %485 = vset.pattern.permute.xlu1 %v537_v32 }
 0x454   :  { %484 = vset.pattern.permute.xlu2 %v535_v11  ;;  %370 = vperm.xlu1 %485, %v504_v41  }
 0x455   :  { %365 = vperm.xlu2 %484, %v504_v41  }
 0x45c   :  { %487 = vset.pattern.permute.xlu1 %v538_v33 }
 0x45d   :  { %486 = vset.pattern.permute.xlu2 %v533_v3 }
 0x4a6   :  { %v351_v42 = vpop.permute.xlu2 %350 }
 0x4a7   :  { %v353_v47 = vmul.f32 %v351_v42, %v596_v16  ;;  %v26_v16 = vld [vmem:[%s703_s3] sm:$0x1f]  ;;  %s539_s3 = smov [#allocation2]  }
 0x4a8   :  { %v82_v60 = vperm.slane %v26_v16, 0  ;;  %v86_v0 = vperm.slane %v26_v16, 4  ;;  %s427_s8 = sshll.u32 %s539_s3, 4  ;;  %s428_s8 = int_to_ptr.vmem [resolvable:$true] %s427_s8 }
 0x4a9   :  { %v375_v51 = vrot.slane %v353_v47, 6 }
 0x4ab   :  { %v377_v3 = vadd.f32 %v375_v51, %v653_v48 }
 0x4af   :  { %v366_v50 = vpop.permute.xlu2 %365 }
 0x4b0   :  { %v368_v53 = vmul.f32 %v366_v50, %v598_v17  ;;  %v84_v17 = vperm.slane %v26_v16, 2 }
 0x4bd   :  { %v361_v43 = vpop.permute.xlu1 %360  ;;  %v356_v44 = vpop.permute.xlu0 %355 }
 0x4be   :  { %v363_v45 = vmul.f32 %v361_v43, %v594_v15  ;;  %v358_v46 = vmul.f32 %v356_v44, %v592_v14 }
 0x4c0   :  { %v378_v49 = vadd.f32 %v363_v45, %v358_v46 }
 0x4c2   :  { %v381_v54 = vrot.slane %v378_v49, 6 }
 0x4c4   :  { %v383_v56 = vadd.f32 %v381_v54, %v377_v3 }
 0x4c6   :  { %v371_v52 = vpop.permute.xlu1 %370 }
 0x4c7   :  { %v373_v33 = vmul.f32 %v371_v52, %v600_v18  ;;  %v83_v18 = vperm.slane %v26_v16, 1 }
 0x4c9   :  { %v379_v55 = vadd.f32 %v373_v33, %v368_v53 }
 0x4cb   :  { %v385_v57 = vrot.slane %v379_v55, 6 }
 0x4cd   :  { %v387_v58 = vadd.f32 %v385_v57, %v383_v56 }
 0x4cf   :  { %505 = vtanh.f32 %v387_v58 }
 0x4d5   :  { %v506_v15 = vpop.eup %505 }
 0x4d6   :  { %401 = vperm.xlu1 %487, %v506_v15   ;;  %396 = vperm.xlu0 %482, %v506_v15  }
 0x4d7   :  { %391 = vperm.xlu2 %486, %v506_v15  }
 0x4de   :  { %489 = vset.pattern.permute.xlu0 %v537_v32  ;;  %v490_v32 = vld [vmem:[%s704_s4] ss:$0 sm:$0xff] }
 0x4df   :  { %488 = vset.pattern.permute.xlu2 %v535_v11  ;;  %411 = vperm.xlu0 %489, %v506_v15   ;;  %v85_v11 = vperm.slane %v26_v16, 3 }
 0x4e0   :  { %406 = vperm.xlu2 %488, %v506_v15  }
 0x531   :  { %v392_v14 = vpop.permute.xlu2 %391 }
 0x532   :  { %v394_v63 = vmul.f32 %v392_v14, %v82_v60 }
 0x534   :  { %v415_v5 = vadd.f32 %v490_v32, %v394_v63 }
 0x53a   :  { %v407_v1 = vpop.permute.xlu2 %406 }
 0x53b   :  { %v409_v6 = vmul.f32 %v407_v1, %v85_v11 }
 0x548   :  { %v397_v48 = vpop.permute.xlu0 %396  ;;  %v402_v59 = vpop.permute.xlu1 %401 }
 0x549   :  { %v404_v61 = vmul.f32 %v402_v59, %v84_v17  ;;  %v399_v62 = vmul.f32 %v397_v48, %v83_v18 }
 0x54b   :  { %v416_v2 = vadd.f32 %v404_v61, %v399_v62 }
 0x54d   :  { %v418_v8 = vadd.f32 %v416_v2, %v415_v5 }
 0x551   :  { %v412_v4 = vpop.permute.xlu0 %411 }
 0x552   :  { %v414_v7 = vmul.f32 %v412_v4, %v86_v0 }
 0x554   :  { %v417_v9 = vadd.f32 %v414_v7, %v409_v6 }
 0x556   :  { %v419_v10 = vadd.f32 %v418_v8, %v417_v9 }
 0x558   :  { %421 = vst.msk [vmem:[#allocation2 - $0x6] sm:$0xc0] %vm420_vm4, %v419_v10 }
 0x559   :  { %432 = dma.vmem_to_hbm [thread:$0]  %s428_s8, 32, %s430_s11, [#allocation3]  }
 0x55a   :  { %531 = dma.done.wait [#allocation3], 32  }
 0x55b   :  { %532 = vsyncadd [#allocation3], 4294967264 }
 0x55c   :  { %437 = vsyncpa [#allocation3], 1 }

</bundles_post_ra>
